<compile_context>
chip_gen: v5e
topology: v5e:2x2
jax: 0.10.0
libtpu: 0.0.40
codegen_flags: <defaults>
</compile_context>

<pallas_src>
import jax
import jax.numpy as jnp
from jax.experimental import pallas as pl
from jax.experimental.pallas import tpu as pltpu

HIDDEN1 = 128          # layer1 out (already lane-native)
HIDDEN2_PAD = 128      # layer2 out padded from 64 -> 128
OUT_PAD = 128          # n_actions padded up to one full lane width


def _round_up(v, m):
    return (v + m - 1) // m * m


def _dqn_kernel(x_ref, w1_ref, b1_ref, w2_ref, b2_ref, w3_ref, b3_ref, o_ref):
    # Fused 3-layer MLP on one batch tile. bf16 MXU operands, f32 accumulation,
    # f32 bias-add/ReLU.
    x = x_ref[...]                                                   # bf16 (tile_b, n_obs)
    h1 = jnp.dot(x, w1_ref[...], preferred_element_type=jnp.float32) + b1_ref[...]
    h1 = jnp.maximum(h1, 0.0)
    h2 = jnp.dot(h1.astype(jnp.bfloat16), w2_ref[...],
                 preferred_element_type=jnp.float32) + b2_ref[...]
    h2 = jnp.maximum(h2, 0.0)
    out = jnp.dot(h2.astype(jnp.bfloat16), w3_ref[...],
                  preferred_element_type=jnp.float32) + b3_ref[...]
    o_ref[...] = out.astype(o_ref.dtype)


def init_dqn_params(key, n_observations, n_actions):
    """Deterministic init mimicking torch.nn.Linear default U[-1/sqrt(fan_in), 1/sqrt(fan_in)].

    Weights are stored as (in, out) so the kernel computes x @ W + b, which is
    identical to torch's x @ W^T + b with W of shape (out, in).
    """
    def linear(key, fan_in, fan_out):
        kw, kb = jax.random.split(key)
        bound = 1.0 / jnp.sqrt(jnp.float32(fan_in))
        w = jax.random.uniform(kw, (fan_in, fan_out), jnp.float32, -bound, bound)
        b = jax.random.uniform(kb, (1, fan_out), jnp.float32, -bound, bound)
        return w, b

    k1, k2, k3 = jax.random.split(key, 3)
    w1, b1 = linear(k1, n_observations, 128)
    w2, b2 = linear(k2, 128, 64)
    w3, b3 = linear(k3, 64, n_actions)
    return {"w1": w1, "b1": b1, "w2": w2, "b2": b2, "w3": w3, "b3": b3}


def pack_params(params):
    """One-time repack: zero-pad the 64-wide hidden and n_actions-wide output to
    128 lanes and cast matmul operands to bf16 (biases stay f32)."""
    n_actions = params["w3"].shape[1]
    w1 = params["w1"].astype(jnp.bfloat16)                                   # (n_obs, 128)
    b1 = params["b1"].astype(jnp.float32)                                    # (1, 128)
    w2 = jnp.pad(params["w2"], ((0, 0), (0, HIDDEN2_PAD - 64))).astype(jnp.bfloat16)   # (128, 128)
    b2 = jnp.pad(params["b2"], ((0, 0), (0, HIDDEN2_PAD - 64))).astype(jnp.float32)    # (1, 128)
    w3 = jnp.pad(params["w3"], ((0, HIDDEN2_PAD - 64),
                                (0, OUT_PAD - n_actions))).astype(jnp.bfloat16)        # (128, 128)
    b3 = jnp.pad(params["b3"], ((0, 0), (0, OUT_PAD - n_actions))).astype(jnp.float32) # (1, 128)
    return {"w1": w1, "b1": b1, "w2": w2, "b2": b2, "w3": w3, "b3": b3}


def dqn_forward(x, packed, n_actions):
    """Pallas forward pass. x: (B, n_observations) f32. Returns (B, n_actions) f32."""
    B, n_obs = x.shape
    w1, b1 = packed["w1"], packed["b1"]
    w2, b2 = packed["w2"], packed["b2"]
    w3, b3 = packed["w3"], packed["b3"]

    # Batch tile: fill the MXU's M dimension for big batches, single small tile
    # for tiny (acting-time) batches.
    tile_b = 256 if B >= 256 else _round_up(max(B, 1), 8)
    b_pad = _round_up(B, tile_b)

    xb = x.astype(jnp.bfloat16)
    if b_pad != B:
        xb = jnp.pad(xb, ((0, b_pad - B), (0, 0)))

    grid = (b_pad // tile_b,)

    flops = 2 * b_pad * (n_obs * HIDDEN1 + HIDDEN1 * HIDDEN2_PAD + HIDDEN2_PAD * OUT_PAD)
    bytes_accessed = (
        xb.size * xb.dtype.itemsize
        + sum(v.size * v.dtype.itemsize for v in (w1, b1, w2, b2, w3, b3))
        + b_pad * OUT_PAD * 4
    )

    out_padded = pl.pallas_call(
        _dqn_kernel,
        out_shape=jax.ShapeDtypeStruct((b_pad, OUT_PAD), jnp.float32),
        grid=grid,
        in_specs=[
            pl.BlockSpec((tile_b, n_obs), lambda i: (i, 0)),          # x: tiled over batch
            pl.BlockSpec(w1.shape, lambda i: (0, 0)),                 # weights/biases: resident
            pl.BlockSpec(b1.shape, lambda i: (0, 0)),
            pl.BlockSpec(w2.shape, lambda i: (0, 0)),
            pl.BlockSpec(b2.shape, lambda i: (0, 0)),
            pl.BlockSpec(w3.shape, lambda i: (0, 0)),
            pl.BlockSpec(b3.shape, lambda i: (0, 0)),
        ],
        out_specs=pl.BlockSpec((tile_b, OUT_PAD), lambda i: (i, 0)),  # lane-dense output
        compiler_params=pltpu.CompilerParams(
            dimension_semantics=("parallel",)),                       # v7x: shard across TCs
        cost_estimate=pl.CostEstimate(
            flops=flops, transcendentals=0, bytes_accessed=bytes_accessed),
    )(xb, w1, b1, w2, b2, w3, b3)

    return out_padded[:B, :n_actions]


def dqn_reference(x, params):
    """Pure-JAX f32 reference of the same forward pass."""
    h1 = jnp.maximum(x @ params["w1"] + params["b1"], 0.0)
    h2 = jnp.maximum(h1 @ params["w2"] + params["b2"], 0.0)
    return h2 @ params["w3"] + params["b3"]


def dqn_reference_bf16(x, params):
    """Reference mirroring the kernel's bf16-operand / f32-accumulate numerics."""
    bf = jnp.bfloat16
    h1 = jnp.maximum(
        jnp.dot(x.astype(bf), params["w1"].astype(bf),
                preferred_element_type=jnp.float32) + params["b1"], 0.0)
    h2 = jnp.maximum(
        jnp.dot(h1.astype(bf), params["w2"].astype(bf),
                preferred_element_type=jnp.float32) + params["b2"], 0.0)
    return jnp.dot(h2.astype(bf), params["w3"].astype(bf),
                   preferred_element_type=jnp.float32) + params["b3"]


if __name__ == "__main__":
    key = jax.random.PRNGKey(0)
    k_params, k_x1, k_x2 = jax.random.split(key, 3)

    n_observations = 32   # flattened state vector size
    n_actions = 8

    params = init_dqn_params(k_params, n_observations, n_actions)
    packed = pack_params(params)

    # Case 1: tiny acting-time batch (single tile).
    x_small = jax.random.normal(k_x1, (2, n_observations), jnp.float32)
    out_small = jax.block_until_ready(dqn_forward(x_small, packed, n_actions))
    assert out_small.shape == (2, n_actions)
    assert jnp.allclose(out_small, dqn_reference_bf16(x_small, params), atol=1e-3, rtol=1e-3)
    assert jnp.allclose(out_small, dqn_reference(x_small, params), atol=5e-2, rtol=5e-2)

    # Case 2: training-time batch (multi-tile grid, uneven -> exercises padding).
    x_big = jax.random.normal(k_x2, (300, n_observations), jnp.float32)
    out_big = jax.block_until_ready(dqn_forward(x_big, packed, n_actions))
    assert out_big.shape == (300, n_actions)
    assert jnp.allclose(out_big, dqn_reference_bf16(x_big, params), atol=1e-3, rtol=1e-3)
    assert jnp.allclose(out_big, dqn_reference(x_big, params), atol=5e-2, rtol=5e-2)

    print("KERNEL_OK")
</pallas_src>

<mosaic_0001>
module attributes {stable_mosaic.version = 11 : i64} {
  func.func @_dqn_kernel(%arg0: i32, %arg1: memref<8x32xbf16, #tpu.memory_space<vmem>>, %arg2: memref<32x128xbf16, #tpu.memory_space<vmem>>, %arg3: memref<1x128xf32, #tpu.memory_space<vmem>>, %arg4: memref<128x128xbf16, #tpu.memory_space<vmem>>, %arg5: memref<1x128xf32, #tpu.memory_space<vmem>>, %arg6: memref<128x128xbf16, #tpu.memory_space<vmem>>, %arg7: memref<1x128xf32, #tpu.memory_space<vmem>>, %arg8: memref<8x128xf32, #tpu.memory_space<vmem>>) attributes {dimension_semantics = [#tpu.dimension_semantics<parallel>], iteration_bounds = array<i64: 1>, scalar_prefetch = 0 : i64, scratch_operands = 0 : i64, tpu.core_type = #tpu.core_type<tc>, window_params = [{transform_indices = @transform_0, window_bounds = array<i64: 8, 32>}, {pipeline_mode = #tpu.pipeline_mode<synchronous>, transform_indices = @transform_1, window_bounds = array<i64: 32, 128>}, {pipeline_mode = #tpu.pipeline_mode<synchronous>, transform_indices = @transform_2, window_bounds = array<i64: 1, 128>}, {pipeline_mode = #tpu.pipeline_mode<synchronous>, transform_indices = @transform_3, window_bounds = array<i64: 128, 128>}, {pipeline_mode = #tpu.pipeline_mode<synchronous>, transform_indices = @transform_4, window_bounds = array<i64: 1, 128>}, {pipeline_mode = #tpu.pipeline_mode<synchronous>, transform_indices = @transform_5, window_bounds = array<i64: 128, 128>}, {pipeline_mode = #tpu.pipeline_mode<synchronous>, transform_indices = @transform_6, window_bounds = array<i64: 1, 128>}, {transform_indices = @transform_7, window_bounds = array<i64: 8, 128>}]} {
    %c0 = arith.constant 0 : index
    %c0_0 = arith.constant 0 : index
    %0 = vector.load %arg1[%c0, %c0_0] : memref<8x32xbf16, #tpu.memory_space<vmem>>, vector<8x32xbf16>
    %c0_1 = arith.constant 0 : index
    %c0_2 = arith.constant 0 : index
    %1 = vector.load %arg2[%c0_1, %c0_2] : memref<32x128xbf16, #tpu.memory_space<vmem>>, vector<32x128xbf16>
    %cst = arith.constant dense<0.000000e+00> : vector<8x128xf32>
    %2 = tpu.matmul %0, %1, %cst {dimension_numbers = #tpu.dot_dimension_numbers<[1], [0], [0], [1], [0, 0, 1, 1], [], []>} : vector<8x32xbf16>, vector<32x128xbf16>, vector<8x128xf32> -> vector<8x128xf32>
    %c0_3 = arith.constant 0 : index
    %c0_4 = arith.constant 0 : index
    %3 = vector.load %arg3[%c0_3, %c0_4] : memref<1x128xf32, #tpu.memory_space<vmem>>, vector<1x128xf32>
    %4 = vector.broadcast %3 : vector<1x128xf32> to vector<8x128xf32>
    %5 = arith.addf %2, %4 : vector<8x128xf32>
    %cst_5 = arith.constant 0.000000e+00 : f32
    %6 = vector.broadcast %cst_5 : f32 to vector<8x128xf32>
    %7 = arith.maximumf %5, %6 : vector<8x128xf32>
    %8 = arith.truncf %7 : vector<8x128xf32> to vector<8x128xbf16>
    %c0_6 = arith.constant 0 : index
    %c0_7 = arith.constant 0 : index
    %9 = vector.load %arg4[%c0_6, %c0_7] : memref<128x128xbf16, #tpu.memory_space<vmem>>, vector<128x128xbf16>
    %cst_8 = arith.constant dense<0.000000e+00> : vector<8x128xf32>
    %10 = tpu.matmul %8, %9, %cst_8 {dimension_numbers = #tpu.dot_dimension_numbers<[1], [0], [0], [1], [0, 0, 1, 1], [], []>} : vector<8x128xbf16>, vector<128x128xbf16>, vector<8x128xf32> -> vector<8x128xf32>
    %c0_9 = arith.constant 0 : index
    %c0_10 = arith.constant 0 : index
    %11 = vector.load %arg5[%c0_9, %c0_10] : memref<1x128xf32, #tpu.memory_space<vmem>>, vector<1x128xf32>
    %12 = vector.broadcast %11 : vector<1x128xf32> to vector<8x128xf32>
    %13 = arith.addf %10, %12 : vector<8x128xf32>
    %cst_11 = arith.constant 0.000000e+00 : f32
    %14 = vector.broadcast %cst_11 : f32 to vector<8x128xf32>
    %15 = arith.maximumf %13, %14 : vector<8x128xf32>
    %16 = arith.truncf %15 : vector<8x128xf32> to vector<8x128xbf16>
    %c0_12 = arith.constant 0 : index
    %c0_13 = arith.constant 0 : index
    %17 = vector.load %arg6[%c0_12, %c0_13] : memref<128x128xbf16, #tpu.memory_space<vmem>>, vector<128x128xbf16>
    %cst_14 = arith.constant dense<0.000000e+00> : vector<8x128xf32>
    %18 = tpu.matmul %16, %17, %cst_14 {dimension_numbers = #tpu.dot_dimension_numbers<[1], [0], [0], [1], [0, 0, 1, 1], [], []>} : vector<8x128xbf16>, vector<128x128xbf16>, vector<8x128xf32> -> vector<8x128xf32>
    %c0_15 = arith.constant 0 : index
    %c0_16 = arith.constant 0 : index
    %19 = vector.load %arg7[%c0_15, %c0_16] : memref<1x128xf32, #tpu.memory_space<vmem>>, vector<1x128xf32>
    %20 = vector.broadcast %19 : vector<1x128xf32> to vector<8x128xf32>
    %21 = arith.addf %18, %20 : vector<8x128xf32>
    %c0_17 = arith.constant 0 : index
    %c0_18 = arith.constant 0 : index
    %22 = vector.load %arg8[%c0_17, %c0_18] : memref<8x128xf32, #tpu.memory_space<vmem>>, vector<8x128xf32>
    tpu.vector_store %arg8[%c0_17, %c0_18], %21 {strides = array<i32>} : memref<8x128xf32, #tpu.memory_space<vmem>>, vector<8x128xf32>,
    return
  }
  func.func @transform_0(%arg0: i32) -> (i32, i32) {
    %c0_i32 = arith.constant 0 : i32
    %c0_i32_0 = arith.constant 0 : i32
    return %arg0, %c0_i32 : i32, i32
  }
  func.func @transform_1(%arg0: i32) -> (i32, i32) {
    %c0_i32 = arith.constant 0 : i32
    %c0_i32_0 = arith.constant 0 : i32
    %c0_i32_1 = arith.constant 0 : i32
    return %c0_i32, %c0_i32_0 : i32, i32
  }
  func.func @transform_2(%arg0: i32) -> (i32, i32) {
    %c0_i32 = arith.constant 0 : i32
    %c0_i32_0 = arith.constant 0 : i32
    %c0_i32_1 = arith.constant 0 : i32
    return %c0_i32, %c0_i32_0 : i32, i32
  }
  func.func @transform_3(%arg0: i32) -> (i32, i32) {
    %c0_i32 = arith.constant 0 : i32
    %c0_i32_0 = arith.constant 0 : i32
    %c0_i32_1 = arith.constant 0 : i32
    return %c0_i32, %c0_i32_0 : i32, i32
  }
  func.func @transform_4(%arg0: i32) -> (i32, i32) {
    %c0_i32 = arith.constant 0 : i32
    %c0_i32_0 = arith.constant 0 : i32
    %c0_i32_1 = arith.constant 0 : i32
    return %c0_i32, %c0_i32_0 : i32, i32
  }
  func.func @transform_5(%arg0: i32) -> (i32, i32) {
    %c0_i32 = arith.constant 0 : i32
    %c0_i32_0 = arith.constant 0 : i32
    %c0_i32_1 = arith.constant 0 : i32
    return %c0_i32, %c0_i32_0 : i32, i32
  }
  func.func @transform_6(%arg0: i32) -> (i32, i32) {
    %c0_i32 = arith.constant 0 : i32
    %c0_i32_0 = arith.constant 0 : i32
    %c0_i32_1 = arith.constant 0 : i32
    return %c0_i32, %c0_i32_0 : i32, i32
  }
  func.func @transform_7(%arg0: i32) -> (i32, i32) {
    %c0_i32 = arith.constant 0 : i32
    %c0_i32_0 = arith.constant 0 : i32
    return %arg0, %c0_i32 : i32, i32
  }
}

</mosaic_0001>

<bundles_post_ra>
// kernel: tpu_custom_call.1
= control target key start
LH: loop header
LB: loop body
LE: loop exit
PB: predicated region body
PF: predicated region fallthrough
CT: control target
= control target key end

     0   :  { %12 = vsyncpa [#allocation3], 0  ;;  %s613_s0 = inlined_call_operand.hbm [shape: bf16[8,32], index: 0, kind: input, shape index: {}]   ;;  %s614_s1 = inlined_call_operand.hbm [shape: bf16[32,128], index: 1, kind: input, shape index: {}]   ;;  %s615_s2 = inlined_call_operand.vmem [shape: f32[1,128], index: 2, kind: input, shape index: {}]   ;;  %s616_s3 = inlined_call_operand.hbm [shape: bf16[128,128], index: 3, kind: input, shape index: {}]   ;;  %s617_s4 = inlined_call_operand.vmem [shape: f32[1,128], index: 4, kind: input, shape index: {}]   ;;  %s618_s5 = inlined_call_operand.hbm [shape: bf16[128,128], index: 5, kind: input, shape index: {}]   ;;  %s619_s6 = inlined_call_operand.vmem [shape: f32[1,128], index: 6, kind: input, shape index: {}]   ;;  %s620_s7 = inlined_call_operand.hbm [shape: f32[8,128], index: 7, kind: output, shape index: {}]  }
   0x1   :  { %13 = vsyncpa [#allocation6], 0 }
   0x2   :  { %14 = vsyncpa [#allocation9], 0  ;;  %s31_s26 = sshll.u32 %s614_s1, 4  ;;  %s32_s26 = int_to_ptr.hbm [resolvable:$true] %s31_s26 }
   0x3   :  { %15 = vsyncpa [#allocation4], 0  ;;  %s542_s27 = smov [#allocation5]   ;;  %s21_s8 = sshll.u32 %s613_s0, 4  ;;  %s22_s8 = int_to_ptr.hbm [resolvable:$true] %s21_s8 }
   0x4   :  { %s33_s28 = sshll.u32 %s542_s27, 4  ;;  %s543_s9 = smov 64   ;;  %s34_s28 = int_to_ptr.vmem [resolvable:$true] %s33_s28 }
   0x5   :  { %s544_s10 = smov 4   ;;  %s545_s11 = smov [#allocation2]  }
   0x6   :  { %39 = dma.hbm_to_vmem [thread:$0]  %s32_s26, 256, %s34_s28, [#allocation6], %s543_s9, %s543_s9, %s544_s10  }
   0x7   :  { %s23_s12 = sshll.u32 %s545_s11, 4  ;;  %s46_s15 = sshll.u32 %s616_s3, 4  ;;  %s24_s12 = int_to_ptr.vmem [resolvable:$true] %s23_s12  ;;  %s47_s15 = int_to_ptr.hbm [resolvable:$true] %s46_s15 }
   0x8   :  { %26 = dma.hbm_to_vmem [thread:$0]  %s22_s8, 64, %s24_s12, [#allocation3]  }
   0x9   :  { %s61_s17 = sshll.u32 %s618_s5, 4  ;;  %s546_s18 = smov [#allocation7]   ;;  %s62_s17 = int_to_ptr.hbm [resolvable:$true] %s61_s17 }
   0xa   :  { %s48_s19 = sshll.u32 %s546_s18, 4  ;;  %s547_s0 = smov [#allocation8]   ;;  %s49_s19 = int_to_ptr.vmem [resolvable:$true] %s48_s19 }
   0xb   :  { %54 = dma.hbm_to_vmem [thread:$0]  %s47_s15, 1024, %s49_s19, [#allocation6], %s543_s9, %s543_s9, %s544_s10  }
   0xc   :  { %s63_s20 = sshll.u32 %s547_s0, 4  ;;  %s64_s20 = int_to_ptr.vmem [resolvable:$true] %s63_s20 }
   0xd   :  { %69 = dma.hbm_to_vmem [thread:$0]  %s62_s17, 1024, %s64_s20, [#allocation9], %s543_s9, %s543_s9, %s544_s10  }
   0xe   :  { %534 = dma.done.wait [#allocation3], 64  }
   0xf   :  { %535 = vsyncadd [#allocation3], 4294967232 }
  0x10   :  { %536 = dma.done.wait [#allocation6], 1280  }
  0x11   :  { %537 = vsyncadd [#allocation6], 4294966016 }
  0x12   :  { %538 = dma.done.wait [#allocation9], 1024  }
  0x13   :  { %539 = vsyncadd [#allocation9], 4294966272  ;;  %v387_v0 = vld [vmem:[#allocation5 + $0x8] sm:$0xff]  ;;  %v386_v2 = vld [vmem:[#allocation5] sm:$0xff]  ;;  %vm110_vm0 = vcmask 261120   ;;  %s548_s24 = smov [#allocation10]  }
  0x14   :  { %v395_v1 = vld [vmem:[#allocation7 + $0x38] sm:$0xff]  ;;  %120 = vmatpush.bf16.msra.mxu0 %v387_v0  ;;  %v394_v3 = vld [vmem:[#allocation7 + $0x30] sm:$0xff]  ;;  %v89_v4 = vld [vmem:[#allocation2] sm:$0xf]  ;;  %s299_s25 = sshll.u32 %s548_s24, 4  ;;  %s301_s28 = sshll.u32 %s620_s7, 4  ;;  %s300_s25 = int_to_ptr.vmem [resolvable:$true] %s299_s25  ;;  %s302_s28 = int_to_ptr.hbm [resolvable:$true] %s301_s28 }
  0x15   :  { %197 = vmatpush.bf16.msra.mxu1 %v395_v1  ;;  %v393_v5 = vld [vmem:[#allocation7 + $0x28] sm:$0xff]  ;;  %v392_v6 = vld [vmem:[#allocation7 + $0x20] sm:$0xff]  ;;  %v391_v7 = vld [vmem:[#allocation7 + $0x18] sm:$0xff] }
  0x16   :  { %v390_v8 = vld [vmem:[#allocation7 + $0x10] sm:$0xff]  ;;  %v389_v9 = vld [vmem:[#allocation7 + $0x8] sm:$0xff]  ;;  %v388_v10 = vld [vmem:[#allocation7] sm:$0xff] }
  0x17   :  { %v403_v11 = vld [vmem:[#allocation8 + $0x38] sm:$0xff]  ;;  %v402_v12 = vld [vmem:[#allocation8 + $0x30] sm:$0xff]  ;;  %v401_v13 = vld [vmem:[#allocation8 + $0x28] sm:$0xff] }
  0x18   :  { %121 = vmatpush.bf16.msra.mxu0 %v386_v2  ;;  %280 = vmatpush.bf16.msra.mxu2 %v403_v11  ;;  %v400_v14 = vld [vmem:[#allocation8 + $0x20] sm:$0xff]  ;;  %v399_v15 = vld [vmem:[#allocation8 + $0x18] sm:$0xff]  ;;  %v398_v16 = vld [vmem:[#allocation8 + $0x10] sm:$0xff] }
  0x19   :  { %198 = vmatpush.bf16.msra.mxu1 %v394_v3  ;;  %v411_v17 = vld [vmem:[%s615_s2] ss:$0 sm:$0xff]  ;;  %v396_v24 = vld [vmem:[#allocation8] sm:$0xff] }
  0x1a   :  { %v397_v23 = vld [vmem:[#allocation8 + $0x8] sm:$0xff] }
  0x1b   :  { %321 = vmatmul.msk.bf16.vlgmr.msra.gmra.mxu0 %vm110_vm0, %v89_v4  ;;  %v412_v25 = vld [vmem:[%s617_s4] ss:$0 sm:$0xff] }
  0x1c   :  { %281 = vmatpush.bf16.msra.mxu2 %v402_v12  ;;  %v413_v31 = vld [vmem:[%s619_s6] ss:$0 sm:$0xff] }
  0x1d   :  { %199 = vmatpush.bf16.msra.mxu1 %v393_v5 }
  0x20   :  { %282 = vmatpush.bf16.msra.mxu2 %v401_v13 }
  0x21   :  { %200 = vmatpush.bf16.msra.mxu1 %v392_v6 }
  0x24   :  { %283 = vmatpush.bf16.msra.mxu2 %v400_v14 }
  0x25   :  { %201 = vmatpush.bf16.msra.mxu1 %v391_v7 }
  0x28   :  { %284 = vmatpush.bf16.msra.mxu2 %v399_v15 }
  0x29   :  { %202 = vmatpush.bf16.msra.mxu1 %v390_v8 }
  0x2c   :  { %285 = vmatpush.bf16.msra.mxu2 %v398_v16 }
  0x2d   :  { %203 = vmatpush.bf16.msra.mxu1 %v389_v9 }
  0x30   :  { %286 = vmatpush.bf16.msra.mxu2 %v397_v23 }
  0x31   :  { %204 = vmatpush.bf16.msra.mxu1 %v388_v10 }
  0x34   :  { %287 = vmatpush.bf16.msra.mxu2 %v396_v24 }
  0x98   :  { %v123_v18 = vpop.f32.mrf.mxu0 }
  0x99   :  { %v124_v19 = vadd.f32 %v411_v17, %v123_v18 }
  0x9b   :  { %v127_v20 = vmax.f32 %v124_v19, 0.0 }
  0x9d   :  { %v128_v21 = vpack.c.bf16 %v127_v20, %v127_v20 }
  0x9f   :  { %205 = vmatmul.bf16.vlgmr.msra.gmra.mxu1 %v128_v21 }
  0xa0   :  { %v125_v22 = vpop.f32.mrf.mxu0 }
 0x11c   :  { %v206_v26 = vpop.f32.mrf.mxu1 }
 0x11d   :  { %v207_v27 = vadd.f32 %v412_v25, %v206_v26 }
 0x11f   :  { %v210_v28 = vmax.f32 %v207_v27, 0.0 }
 0x121   :  { %v211_v29 = vpack.c.bf16 %v210_v28, %v210_v28 }
 0x123   :  { %288 = vmatmul.bf16.vlgmr.msra.gmra.mxu2 %v211_v29 }
 0x124   :  { %v208_v30 = vpop.f32.mrf.mxu1 }
 0x1a6   :  { %v289_v32 = vpop.f32.mrf.mxu2 }
 0x1a7   :  { %v290_v33 = vadd.f32 %v413_v31, %v289_v32 }
 0x1a9   :  { %293 = vst [vmem:[#allocation10] sm:$0xff] %v290_v33 }
 0x1aa   :  { %304 = dma.vmem_to_hbm [thread:$0]  %s300_s25, 128, %s302_s28, [#allocation4]  }
 0x1ae   :  { %v291_v34 = vpop.f32.mrf.mxu2 }
 0x1af   :  { %540 = dma.done.wait [#allocation4], 128  }
 0x1b0   :  { %541 = vsyncadd [#allocation4], 4294967168 }
 0x1b1   :  { %309 = vsyncpa [#allocation3], 1 }
 0x1b2   :  { %310 = vsyncpa [#allocation6], 1 }
 0x1b3   :  { %311 = vsyncpa [#allocation9], 1 }
 0x1b4   :  { %312 = vsyncpa [#allocation4], 1 }

</bundles_post_ra>
